<compile_context>
chip_gen: v7x
topology: tpu7x:2x2x1
jax: 0.10.0
libtpu: 0.0.40
codegen_flags: <defaults>
</compile_context>

<pallas_src>
import jax
import jax.numpy as jnp
from jax import lax
from jax.experimental import pallas as pl
from jax.experimental.pallas import tpu as pltpu


# ----------------------------------------------------------------------------
# Kernel
# ----------------------------------------------------------------------------
def _mean_pool_kernel(h_ref, m_ref, o_ref, acc_ref, cnt_ref):
    """One (batch_tile, seq_tile) step of the masked-mean streaming reduction.

    h_ref:   (TB, TS, H)  hidden states, native dtype
    m_ref:   (TB, 1, TS)  mask, native integer dtype, S lane-dense
    o_ref:   (TB, 1, H)   output (written on the last seq step only)
    acc_ref: (TB, 1, H)   f32 running masked-embedding sum
    cnt_ref: (TB, 1, 1)   f32 running mask sum
    """
    s = pl.program_id(1)

    @pl.when(s == 0)
    def _init():
        acc_ref[...] = jnp.zeros_like(acc_ref)
        cnt_ref[...] = jnp.zeros_like(cnt_ref)

    m = m_ref[...]                          # (TB, 1, TS), native dtype
    mh = m.astype(h_ref.dtype)              # exact for 0/1 masks

    # f32 inputs: force the accurate multi-pass MXU path so we match the
    # f32 PyTorch reference; bf16 inputs use the native bf16 MXU path.
    precision = lax.Precision.HIGHEST if h_ref.dtype == jnp.float32 else None

    # MXU batched matvec: (TB, 1, TS) x (TB, TS, H) -> (TB, 1, H), f32 acc.
    acc_ref[...] += lax.dot_general(
        mh, h_ref[...],
        dimension_numbers=(((2,), (1,)), ((0,), (0,))),
        preferred_element_type=jnp.float32,
        precision=precision)

    # Mask count: lane reduction of the lane-dense mask tile.
    cnt_ref[...] += jnp.sum(m.astype(jnp.float32), axis=2, keepdims=True)

    @pl.when(s == pl.num_programs(1) - 1)
    def _finalize():
        denom = jnp.maximum(cnt_ref[...], 1e-9)      # torch.clamp(min=1e-9)
        inv = 1.0 / denom                            # (TB,1,1): one divide/row
        o_ref[...] = (acc_ref[...] * inv).astype(o_ref.dtype)


# ----------------------------------------------------------------------------
# Tile / VMEM helpers
# ----------------------------------------------------------------------------
def _divisors(n):
    return [d for d in range(1, n + 1) if n % d == 0]


def _round_up(x, m):
    return ((x + m - 1) // m) * m


def _vmem_limit_bytes():
    """Generation-aware scoped-VMEM target (v5e/v6e: 128 MiB phys, v7x: 64)."""
    physical = None
    try:
        physical = pltpu.get_tpu_info().vmem_capacity_bytes
    except Exception:
        physical = None
    if physical is None:
        try:
            kind = jax.devices()[0].device_kind.lower()
        except Exception:
            kind = ""
        physical = 64 * 1024 * 1024 if "v7" in kind else 128 * 1024 * 1024
    return int(min(physical // 2, 64 * 1024 * 1024))


def _select_tiles(B, S, H, h_itemsize, m_itemsize, vmem_limit,
                  batch_tile, seq_tile):
    budget = (vmem_limit * 3) // 4
    target_hidden_buf = 4 * 1024 * 1024   # DMA saturates around 1-4 MiB/buffer

    if batch_tile is None:
        # >= 2 programs on the "parallel" batch axis (both v7x TCs busy).
        # batch_tile only appears in leading block dims, so any divisor works.
        cands = [d for d in _divisors(B) if B // d >= 2] or [B]
        small = [d for d in cands if d <= 8]
        batch_tile = max(small) if small else min(cands)

    def usage(bt, ts):
        hid = 2 * bt * ts * H * h_itemsize                      # double-buffered
        msk = 2 * bt * 8 * _round_up(ts, 128) * m_itemsize      # sublane-padded
        out = 2 * bt * 8 * _round_up(H, 128) * 4                # (bt,1,H) f32
        acc = bt * 8 * _round_up(H, 128) * 4
        cnt = bt * 8 * 128 * 4
        return hid + msk + out + acc + cnt

    if seq_tile is None:
        valid = [d for d in _divisors(S) if d % 128 == 0 or d == S]
        fitting = [d for d in valid
                   if batch_tile * d * H * h_itemsize <= target_hidden_buf
                   and usage(batch_tile, d) <= budget]
        seq_tile = max(fitting) if fitting else min(valid)

    return batch_tile, seq_tile


# ----------------------------------------------------------------------------
# Wrapper
# ----------------------------------------------------------------------------
def mean_pooling(last_hidden_state, attention_mask, *, batch_tile=None,
                 seq_tile=None):
    """Masked mean pooling over axis 1.

    last_hidden_state: [B, S, H] float (f32 / bf16 / ...)
    attention_mask:    [B, S]    any numeric / bool dtype
    returns:           [B, H]    float32
    """
    B, S, H = last_hidden_state.shape
    assert attention_mask.shape == (B, S)
    h_itemsize = jnp.dtype(last_hidden_state.dtype).itemsize

    # Keep the mask in a cheap native dtype; cast happens inside the kernel.
    if attention_mask.dtype == jnp.bool_:
        attention_mask = attention_mask.astype(jnp.int32)
    m_itemsize = jnp.dtype(attention_mask.dtype).itemsize

    # Lane-dense mask layout: S on lanes, unit sublane dim (rank-3 so no
    # in-kernel reshapes are needed for the batched MXU contraction).
    mask3 = attention_mask.reshape(B, 1, S)

    vmem_limit = _vmem_limit_bytes()
    batch_tile, seq_tile = _select_tiles(
        B, S, H, h_itemsize, m_itemsize, vmem_limit, batch_tile, seq_tile)

    assert B % batch_tile == 0, (B, batch_tile)
    assert S % seq_tile == 0, (S, seq_tile)

    grid = (B // batch_tile, S // seq_tile)

    cost = pl.CostEstimate(
        flops=2 * B * S * H,
        transcendentals=0,
        bytes_accessed=B * S * H * h_itemsize + B * S * m_itemsize + B * H * 4,
    )

    out3 = pl.pallas_call(
        _mean_pool_kernel,
        out_shape=jax.ShapeDtypeStruct((B, 1, H), jnp.float32),
        grid_spec=pltpu.PrefetchScalarGridSpec(
            num_scalar_prefetch=0,
            grid=grid,
            in_specs=[
                pl.BlockSpec((batch_tile, seq_tile, H), lambda i, s: (i, s, 0)),
                pl.BlockSpec((batch_tile, 1, seq_tile), lambda i, s: (i, 0, s)),
            ],
            out_specs=pl.BlockSpec((batch_tile, 1, H), lambda i, s: (i, 0, 0)),
            scratch_shapes=[
                pltpu.VMEM((batch_tile, 1, H), jnp.float32),  # embedding sum
                pltpu.VMEM((batch_tile, 1, 1), jnp.float32),  # mask sum
            ],
        ),
        compiler_params=pltpu.CompilerParams(
            dimension_semantics=("parallel", "arbitrary"),
            vmem_limit_bytes=vmem_limit,
        ),
        cost_estimate=cost,
    )(last_hidden_state, mask3)

    return out3.reshape(B, H)


# ----------------------------------------------------------------------------
# Pure-JAX reference (mirrors the PyTorch module)
# ----------------------------------------------------------------------------
def _reference(last_hidden_state, attention_mask):
    mask = attention_mask[..., None].astype(jnp.float32)
    s = jnp.sum(last_hidden_state.astype(jnp.float32) * mask, axis=1)
    d = jnp.maximum(jnp.sum(mask, axis=1), 1e-9)
    return s / d


if __name__ == "__main__":
    # Case 1: small shapes matching the module spec (f32).
    key = jax.random.PRNGKey(0)
    k_h, k_m = jax.random.split(key)

    B, S, H = 2, 8, 32
    last_hidden_state = jax.random.normal(k_h, (B, S, H), dtype=jnp.float32)
    attention_mask = (jax.random.uniform(k_m, (B, S)) > 0.3).astype(jnp.int32)
    attention_mask = attention_mask.at[:, 0].set(1)  # >=1 valid token per row

    out = jax.block_until_ready(mean_pooling(last_hidden_state, attention_mask))
    ref = _reference(last_hidden_state, attention_mask)
    assert out.shape == (B, H)
    assert jnp.allclose(out, ref, atol=1e-5, rtol=1e-5)

    # Case 2: bf16 input, multi-step sequence reduction and >=2 batch programs
    # (grid = (2, 2)) to exercise the accumulator init/finalize path.
    k_h2, k_m2 = jax.random.split(jax.random.PRNGKey(1))
    B2, S2, H2 = 16, 256, 128
    h2 = jax.random.normal(k_h2, (B2, S2, H2), dtype=jnp.bfloat16)
    m2 = (jax.random.uniform(k_m2, (B2, S2)) > 0.5).astype(jnp.int32)
    m2 = m2.at[:, 0].set(1)

    out2 = jax.block_until_ready(
        mean_pooling(h2, m2, batch_tile=8, seq_tile=128))
    ref2 = _reference(h2, m2)
    assert out2.shape == (B2, H2)
    assert jnp.allclose(out2, ref2, atol=1e-3, rtol=1e-3)

    print("KERNEL_OK")
</pallas_src>

<mosaic_0001>
module attributes {stable_mosaic.version = 11 : i64} {
  func.func @_mean_pool_kernel(%arg0: i32, %arg1: i32, %arg2: memref<1x8x32xf32, #tpu.memory_space<vmem>>, %arg3: memref<1x1x8xi32, #tpu.memory_space<vmem>>, %arg4: memref<1x1x32xf32, #tpu.memory_space<vmem>>, %arg5: memref<1x1x32xf32, #tpu.memory_space<vmem>>, %arg6: memref<1x1x1xf32, #tpu.memory_space<vmem>>) attributes {dimension_semantics = [#tpu.dimension_semantics<parallel>, #tpu.dimension_semantics<arbitrary>], iteration_bounds = array<i64: 2, 1>, scalar_prefetch = 0 : i64, scratch_operands = 2 : i64, tpu.core_type = #tpu.core_type<tc>, window_params = [{transform_indices = @transform_0, window_bounds = array<i64: 1, 8, 32>}, {transform_indices = @transform_1, window_bounds = array<i64: 1, 1, 8>}, {transform_indices = @transform_2, window_bounds = array<i64: 1, 1, 32>}]} {
    %c0_i32 = arith.constant 0 : i32
    %0 = arith.cmpi eq, %arg1, %c0_i32 : i32
    %1 = arith.extui %0 : i1 to i32
    %c0_i32_0 = arith.constant 0 : i32
    %2 = arith.cmpi ne, %1, %c0_i32_0 : i32
    scf.if %2 {
      %cst_21 = arith.constant 0.000000e+00 : f32
      %19 = vector.broadcast %cst_21 : f32 to vector<1x1x32xf32>
      %c0_22 = arith.constant 0 : index
      %c0_23 = arith.constant 0 : index
      %c0_24 = arith.constant 0 : index
      %20 = vector.load %arg5[%c0_22, %c0_23, %c0_24] : memref<1x1x32xf32, #tpu.memory_space<vmem>>, vector<1x1x32xf32>
      tpu.vector_store %arg5[%c0_22, %c0_23, %c0_24], %19 {strides = array<i32>} : memref<1x1x32xf32, #tpu.memory_space<vmem>>, vector<1x1x32xf32>,
      %cst_25 = arith.constant 0.000000e+00 : f32
      %21 = vector.broadcast %cst_25 : f32 to vector<1x1x1xf32>
      %c0_26 = arith.constant 0 : index
      %c0_27 = arith.constant 0 : index
      %c0_28 = arith.constant 0 : index
      %22 = vector.load %arg6[%c0_26, %c0_27, %c0_28] : memref<1x1x1xf32, #tpu.memory_space<vmem>>, vector<1x1x1xf32>
      tpu.vector_store %arg6[%c0_26, %c0_27, %c0_28], %21 {strides = array<i32>} : memref<1x1x1xf32, #tpu.memory_space<vmem>>, vector<1x1x1xf32>,
    } else {
    }
    %c0 = arith.constant 0 : index
    %c0_1 = arith.constant 0 : index
    %c0_2 = arith.constant 0 : index
    %3 = vector.load %arg3[%c0, %c0_1, %c0_2] : memref<1x1x8xi32, #tpu.memory_space<vmem>>, vector<1x1x8xi32>
    %4 = arith.sitofp %3 : vector<1x1x8xi32> to vector<1x1x8xf32>
    %c0_3 = arith.constant 0 : index
    %c0_4 = arith.constant 0 : index
    %c0_5 = arith.constant 0 : index
    %5 = vector.load %arg5[%c0_3, %c0_4, %c0_5] : memref<1x1x32xf32, #tpu.memory_space<vmem>>, vector<1x1x32xf32>
    %c0_6 = arith.constant 0 : index
    %c0_7 = arith.constant 0 : index
    %c0_8 = arith.constant 0 : index
    %6 = vector.load %arg2[%c0_6, %c0_7, %c0_8] : memref<1x8x32xf32, #tpu.memory_space<vmem>>, vector<1x8x32xf32>
    %cst = arith.constant dense<0.000000e+00> : vector<1x1x32xf32>
    %7 = tpu.matmul %4, %6, %cst {dimension_numbers = #tpu.dot_dimension_numbers<[2], [1], [1], [2], [0, 0, 0, 1, 1, 2], [0], [0]>, precision = #tpu.contract_precision<fp32>} : vector<1x1x8xf32>, vector<1x8x32xf32>, vector<1x1x32xf32> -> vector<1x1x32xf32>
    %8 = arith.addf %5, %7 : vector<1x1x32xf32>
    %c0_9 = arith.constant 0 : index
    %c0_10 = arith.constant 0 : index
    %c0_11 = arith.constant 0 : index
    %9 = vector.load %arg5[%c0_9, %c0_10, %c0_11] : memref<1x1x32xf32, #tpu.memory_space<vmem>>, vector<1x1x32xf32>
    tpu.vector_store %arg5[%c0_9, %c0_10, %c0_11], %8 {strides = array<i32>} : memref<1x1x32xf32, #tpu.memory_space<vmem>>, vector<1x1x32xf32>,
    %c0_12 = arith.constant 0 : index
    %c0_13 = arith.constant 0 : index
    %c0_14 = arith.constant 0 : index
    %10 = vector.load %arg6[%c0_12, %c0_13, %c0_14] : memref<1x1x1xf32, #tpu.memory_space<vmem>>, vector<1x1x1xf32>
    %11 = arith.sitofp %3 : vector<1x1x8xi32> to vector<1x1x8xf32>
    %cst_15 = arith.constant dense<0.000000e+00> : vector<1x1xf32>
    %12 = vector.multi_reduction <add>, %11, %cst_15 [2] : vector<1x1x8xf32> to vector<1x1xf32>
    %13 = vector.shape_cast %12 : vector<1x1xf32> to vector<1x1x1xf32>
    %14 = arith.addf %10, %13 : vector<1x1x1xf32>
    %c0_16 = arith.constant 0 : index
    %c0_17 = arith.constant 0 : index
    %c0_18 = arith.constant 0 : index
    %15 = vector.load %arg6[%c0_16, %c0_17, %c0_18] : memref<1x1x1xf32, #tpu.memory_space<vmem>>, vector<1x1x1xf32>
    tpu.vector_store %arg6[%c0_16, %c0_17, %c0_18], %14 {strides = array<i32>} : memref<1x1x1xf32, #tpu.memory_space<vmem>>, vector<1x1x1xf32>,
    %c0_i32_19 = arith.constant 0 : i32
    %16 = arith.cmpi eq, %arg1, %c0_i32_19 : i32
    %17 = arith.extui %16 : i1 to i32
    %c0_i32_20 = arith.constant 0 : i32
    %18 = arith.cmpi ne, %17, %c0_i32_20 : i32
    scf.if %18 {
      %c0_21 = arith.constant 0 : index
      %c0_22 = arith.constant 0 : index
      %c0_23 = arith.constant 0 : index
      %19 = vector.load %arg6[%c0_21, %c0_22, %c0_23] : memref<1x1x1xf32, #tpu.memory_space<vmem>>, vector<1x1x1xf32>
      %cst_24 = arith.constant 9.99999971E-10 : f32
      %20 = vector.broadcast %cst_24 : f32 to vector<1x1x1xf32>
      %21 = arith.maximumf %19, %20 : vector<1x1x1xf32>
      %cst_25 = arith.constant 1.000000e+00 : f32
      %22 = vector.broadcast %cst_25 : f32 to vector<1x1x1xf32>
      %23 = arith.divf %22, %21 : vector<1x1x1xf32>
      %c0_26 = arith.constant 0 : index
      %c0_27 = arith.constant 0 : index
      %c0_28 = arith.constant 0 : index
      %24 = vector.load %arg5[%c0_26, %c0_27, %c0_28] : memref<1x1x32xf32, #tpu.memory_space<vmem>>, vector<1x1x32xf32>
      %25 = vector.broadcast %23 : vector<1x1x1xf32> to vector<1x1x32xf32>
      %26 = arith.mulf %24, %25 : vector<1x1x32xf32>
      %c0_29 = arith.constant 0 : index
      %c0_30 = arith.constant 0 : index
      %c0_31 = arith.constant 0 : index
      %27 = vector.load %arg4[%c0_29, %c0_30, %c0_31] : memref<1x1x32xf32, #tpu.memory_space<vmem>>, vector<1x1x32xf32>
      tpu.vector_store %arg4[%c0_29, %c0_30, %c0_31], %26 {strides = array<i32>} : memref<1x1x32xf32, #tpu.memory_space<vmem>>, vector<1x1x32xf32>,
    } else {
    }
    return
  }
  func.func @transform_0(%arg0: i32, %arg1: i32) -> (i32, i32, i32) {
    %c0_i32 = arith.constant 0 : i32
    %c0_i32_0 = arith.constant 0 : i32
    return %arg0, %arg1, %c0_i32 : i32, i32, i32
  }
  func.func @transform_1(%arg0: i32, %arg1: i32) -> (i32, i32, i32) {
    %c0_i32 = arith.constant 0 : i32
    %c0_i32_0 = arith.constant 0 : i32
    return %arg0, %c0_i32, %arg1 : i32, i32, i32
  }
  func.func @transform_2(%arg0: i32, %arg1: i32) -> (i32, i32, i32) {
    %c0_i32 = arith.constant 0 : i32
    %c0_i32_0 = arith.constant 0 : i32
    %c0_i32_1 = arith.constant 0 : i32
    return %arg0, %c0_i32, %c0_i32_0 : i32, i32, i32
  }
}

</mosaic_0001>

<bundles_post_ra>
// kernel: tpu_custom_call.1
= control target key start
LH: loop header
LB: loop body
LE: loop exit
PB: predicated region body
PF: predicated region fallthrough
CT: control target
= control target key end

     0   :  { %7 = vsyncpa [#allocation5], 0  ;;  %s1334_s0 = inlined_call_operand.hbm [shape: f32[2,8,32], index: 0, kind: input, shape index: {}]   ;;  %s1335_s1 = inlined_call_operand.hbm [shape: s32[2,1,8], index: 1, kind: input, shape index: {}]   ;;  %s1336_s2 = inlined_call_operand.hbm [shape: f32[2,1,32], index: 2, kind: output, shape index: {}]  }
   0x1   :  { %9 = vsyncpa [#allocation5 + $0x1], 0 }
   0x2   :  { %10 = vsyncpa [#allocation8], 0 }
   0x3   :  { %12 = vsyncpa [#allocation8 + $0x1], 0 }
   0x4   :  { %13 = vsyncpa [#allocation6], 0 }
   0x5   :  { %15 = vsyncpa [#allocation6 + $0x1], 0  ;;  %s1107_s9 = smov 0   ;;  %s1109_s10 = smov 0  }
   0x6   :  { %s1111_s11 = smov 0   ;;  %s1113_s12 = smov 0  }
   0x7   :  { %s1115_s13 = smov 0   ;;  %s1117_s14 = smov 0  }
   0x8 LB: > { %s811_s15 = sadd.s32 4294967295, %s1084_s14   ;;  %s812_s16 = sadd.s32 4294967294, %s1084_s14   ;;  %s1084_s14 = sphi %s1117_s14, %s21_s14   ;;  %s1080_s13 = sphi %s1115_s13, %s1356_s13   ;;  %s1076_s12 = sphi %s1113_s12, %s1355_s12   ;;  %s1072_s11 = sphi %s1111_s11, %s1354_s11   ;;  %s1068_s10 = sphi %s1109_s10, %s1353_s10   ;;  %s1064_s9 = sphi %s1107_s9, %s1352_s9  }
   0x9   : > { %s33_s17 = sadd.s32 1, %s1080_s13  ;;  %s42_s18 = sadd.s32 1, %s1072_s11 }
   0xa   : > { %p35_p0 = scmp.ge.s32.totalorder %s33_s17, 2  ;;  %p49_p1 = scmp.ne.s32.totalorder %s1072_s11, %s1068_s10 }
   0xb   : > { %p50_p2 = scmp.eq.s32.totalorder %s1084_s14, 0  ;;  %p55_p3 = scmp.ne.s32.totalorder %s1068_s10, %s1064_s9 }
   0xc   : > { %s1358_s17 = smov (%p35_p0, %s33_s17), 0  ;;  %p56_p5 = scmp.eq.s32.totalorder %s811_s15, 0 }
   0xd   : > { %p1148_p4 = por %p50_p2, %p49_p1  ;;  %s37_s20 = ssub.s32 %s1080_s13, %s1358_s17 }
   0xe   : > { %p107_p6 = scmp.eq.s32.totalorder %s811_s15, 1  ;;  %p40_p7 = scmp.eq.s32.totalorder %s37_s20, 0 }
   0xf   : > { %p1154_p8 = por %p56_p5, %p55_p3  ;;  %p113_p10 = scmp.eq.s32.totalorder %s812_s16, 1 }
  0x10   : > { %p1158_p9 = por %p107_p6, %p49_p1  ;;  %p882_p13 = scmp.lt.s32.totalorder %s1084_s14, 2 }
  0x11   : > { %s1340_s21 = scalar_select %p1154_p8, 1, 0 }
  0x12   : > { %s1341_s22 = scalar_select %p1158_p9, 1, 0 }
  0x13   : > { %s1163_s23 = scalar_select %p40_p7, %s1072_s11, %s42_s18  }
  0x14   : > { %p1165_p11 = por %p113_p10, %p55_p3  ;;  %s1172_s25 = sand.u32 1, %s1072_s11  }
  0x15   : > { %s815_s26 = sshll.u32 %s1172_s25, 3  ;;  %s816_s27 = sshll.u32 %s1080_s13, 7 }
  0x16   : > { %s1342_s24 = scalar_select %p1165_p11, 1, 0 }
  0x17   : > { %s1179_s30 = scalar_lea.hbm %s1334_s0, %s816_s27  ;;  %s137_s3 = scalar_lea.vmem [#allocation4], %s815_s26 }
  0x18   : > { %s145_s4 = sshll.u32 %s137_s3, 4  ;;  %p1185_p0 = pnand %p882_p13, %p1148_p4  ;;  %s1181_s4 = int_to_ptr.vmem [resolvable:$true] %s145_s4 }
  0x19   : > { %s134_s6 = scalar_lea.sflag [#allocation5], %s1172_s25  ;;  %s938_s7 = scalar_lea.hbm %s1179_s30, 128 }
  0x1a   : > { %p939_p3 = scmp.ne.s32.totalorder %s1179_s30, %s938_s7  ;;  %p940_p5 = pneg %p1185_p0 }
  0x1b   : > { %s943_s16 = scalar_lea.hbm %s1334_s0, 256  ;;  %p944_p4 = scmp.lt.u32.totalorder %s1179_s30, %s1334_s0 }
  0x1c   : > { %p941_p6 = pnand %p940_p5, %p939_p3  ;;  %p945_p10 = scmp.lt.u32.totalorder %s943_s16, %s938_s7 }
  0x1d   : > { %p947_p12 = scmp.lt.u32.totalorder %s938_s7, %s1179_s30 }
  0x1e   : > { %p942_p7 = pneg %p941_p6  ;;  %p946_p13 = por %p945_p10, %p944_p4 }
  0x20   : > { %p948_p1 = por %p947_p12, %p946_p13 }
  0x22   : > { %p949_p2 = pnand %p948_p1, %p942_p7 }
  0x24   : > { %952 = shalt.err (!%p949_p2)
}
  0x25   : > { %s953_s20 = scalar_lea.vmem %s1181_s4, 128  ;;  %s1086_s26 = smov [#allocation4]  }
  0x26   : > { %p954_p3 = scmp.ne.s32.totalorder %s1181_s4, %s953_s20  ;;  %s958_s27 = sshll.u32 %s1086_s26, 4  ;;  %s959_s27 = int_to_ptr.vmem [resolvable:$false] %s958_s27 }
  0x27   : > { %s960_s28 = scalar_lea.vmem %s959_s27, 256  ;;  %p961_p9 = scmp.lt.s32.totalorder %s1181_s4, %s959_s27 }
  0x28   : > { %p956_p6 = pnand %p954_p3, %p940_p5  ;;  %p962_p4 = scmp.lt.s32.totalorder %s960_s28, %s953_s20 }
  0x2a   : > { %p957_p11 = pneg %p956_p6  ;;  %p963_p10 = por %p962_p4, %p961_p9 }
  0x2c   : > { %p964_p12 = pnand %p963_p10, %p957_p11 }
  0x2e   : > { %967 = shalt.err (!%p964_p12)
}
  0x2f   : > { %874 = dma.hbm_to_vmem [thread:$0]  (!%p1185_p0), %s1179_s30, 128, %s1181_s4, %s134_s6  }
  0x30   : > { %p1344_p1 = scmp.lt.s32.totalorder %s1084_s14, 3  ;;  %p1345_p2 = scmp.ge.s32.totalorder %s1084_s14, 1 }
  0x31   : > { %s817_s3 = sshll.u32 %s1080_s13, 4  ;;  %s155_s7 = scalar_lea.vmem [#allocation7], %s1172_s25 }
  0x32   : > { %p1221_p7 = pnand %p1345_p2, %p1344_p1  ;;  %s163_s8 = sshll.u32 %s155_s7, 4  ;;  %s164_s8 = int_to_ptr.vmem [resolvable:$true] %s163_s8 }
  0x33   : > { %s1230_s18 = scalar_lea.hbm %s1335_s1, %s817_s3  ;;  %s153_s30 = scalar_lea.sflag [#allocation8], %s1172_s25 }
  0x34   : > { %s1346_s29 = scalar_select %p1221_p7, 1, 0 }
  0x35   : > { %s968_s4 = scalar_lea.hbm %s1230_s18, 16  ;;  %s973_s20 = scalar_lea.hbm %s1335_s1, 32 }
  0x36   : > { %p969_p9 = scmp.ne.s32.totalorder %s1230_s18, %s968_s4  ;;  %p974_p3 = scmp.lt.u32.totalorder %s1230_s18, %s1335_s1 }
  0x37   : > { %p975_p6 = scmp.lt.u32.totalorder %s973_s20, %s968_s4  ;;  %p977_p10 = scmp.lt.u32.totalorder %s968_s4, %s1230_s18 }
  0x38   : > { %p971_p11 = pnand %p969_p9, %p940_p5 }
  0x39   : > { %p976_p4 = por %p975_p6, %p974_p3 }
  0x3a   : > { %p972_p13 = pneg %p971_p11 }
  0x3b   : > { %p978_p12 = por %p977_p10, %p976_p4 }
  0x3d   : > { %p979_p1 = pnand %p978_p12, %p972_p13 }
  0x3f   : > { %982 = shalt.err (!%p979_p1)
}
  0x40   : > { %s983_s25 = scalar_lea.vmem %s164_s8, 16  ;;  %s1087_s28 = smov [#allocation7]  }
  0x41   : > { %p984_p2 = scmp.ne.s32.totalorder %s164_s8, %s983_s25  ;;  %s988_s3 = sshll.u32 %s1087_s28, 4  ;;  %s989_s3 = int_to_ptr.vmem [resolvable:$false] %s988_s3 }
  0x42   : > { %s990_s7 = scalar_lea.vmem %s989_s3, 32  ;;  %p991_p8 = scmp.lt.s32.totalorder %s164_s8, %s989_s3 }
  0x43   : > { %p986_p9 = pnand %p984_p2, %p940_p5  ;;  %p992_p7 = scmp.lt.s32.totalorder %s990_s7, %s983_s25 }
  0x45   : > { %p987_p11 = pneg %p986_p9  ;;  %p993_p3 = por %p992_p7, %p991_p8 }
  0x47   : > { %p994_p6 = pnand %p993_p3, %p987_p11 }
  0x49   : > { %997 = shalt.err (!%p994_p6)
}
  0x4a   : > { %877 = dma.hbm_to_vmem [thread:$0]  (!%p1185_p0), %s1230_s18, 16, %s164_s8, %s153_s30  }
  0x4b   : > { %p1347_p13 = scmp.ne.s32.totalorder %s1346_s29, 0 }
  0x4c   : > { %s1255_s15 = sand.u32 (!%p1347_p13), 1, %s1068_s10   ;;  %p1348_p5 = scmp.ne.s32.totalorder (!%p1347_p13), %s1340_s21, 0 }
  0x4d   : > { %172 = sbr.rel (%p1347_p13) target bundleno = 402 (0x192), region = 28  ;;  %s819_s16 = sshll.u32 (!%p1347_p13), %s1255_s15, 3 }
  0x4e   : > { %s175_s4 = scalar_lea.sflag (!%p1347_p13), [#allocation5], %s1255_s15  ;;  %s178_s6 = scalar_lea.vmem (!%p1347_p13), [#allocation4], %s819_s16 }
  0x54   : > { %1051 = dma.done.wait (%p1348_p5), %s175_s4, 128  }
  0x55   : > { %1053 = vsyncadd (%p1348_p5), %s175_s4, 4294967168  ;;  %s184_s5 = scalar_lea.sflag [#allocation8], %s1255_s15  ;;  %s186_s29 = scalar_lea.vmem [#allocation7], %s1255_s15 }
  0x56   : > { %1055 = dma.done.wait (%p1348_p5), %s184_s5, 16  }
  0x57   : > { %1057 = vsyncadd (%p1348_p5), %s184_s5, 4294967280  ;;  %v1088_v0 = vmov 0.0   ;;  %vm1089_vm0 = vmmov 0   ;;  %vm216_vm1 = vcmask 0   ;;  %v218_v1 = vld [vmem:[%s186_s29] sm:$0x1]  ;;  %v696_v42 = vlaneseq }
  0x58   : > { %835 = vmatprep.subr.mxu0 %v1088_v0  ;;  %837 = vmatprep.mubr.msk.f32.mxu0 %vm1089_vm0, %v1088_v0  ;;  %217 = vst.msk [vmem:[#allocation3] sm:$0x1] %vm216_vm1, %v1088_v0  ;;  %vm222_vm2 = vcmask 64512   ;;  %vm676_vm3 = vcmask 57344   ;;  %v221_v2 = vld [vmem:[%s178_s6] sm:$0xff]  ;;  %v219_v3 = vcvt.s32.f32 %v218_v1  ;;  %v1090_v16 = vmov 0  }
  0x59   : > { %840 = vmatprep.subr.mxu1 %v1088_v0  ;;  %842 = vmatprep.mubr.msk.f32.mxu1 %vm1089_vm0, %v1088_v0  ;;  %v227_v4 = vand.u32 4294901760, %v221_v2  ;;  %vm214_vm4 = vcmask 253952   ;;  %v697_v43 = vshrl.u32 %v696_v42, 7  ;;  %s820_s21 = sshll.u32 %s1076_s12, 4  ;;  %s209_s8 = scalar_lea.vmem [#allocation9], %s1255_s15 }
  0x5a   : > { %v677_v5 = vsel %vm676_vm3, %v219_v3, 0.0  ;;  %v224_v6 = vsel %vm222_vm2, %v219_v3, 0  ;;  %935 = vset.pattern.permute.xlu0 %v1090_v16  ;;  %215 = vst.msk [vmem:[#allocation2] sm:$0x1] %vm214_vm4, %v1088_v0  ;;  %s715_s18 = sshll.u32 %s209_s8, 4  ;;  %s1284_s20 = scalar_lea.hbm %s1336_s2, %s820_s21  ;;  %s1286_s18 = int_to_ptr.vmem [resolvable:$true] %s715_s18 }
  0x5b   : > { %836 = vmatpush3.msra.mxu0 %v227_v4  ;;  %v304_v7 = vsub.f32 %v221_v2, %v227_v4  ;;  %678 = vadd.xlane.f32.xlu0 %v677_v5  ;;  %v292_v8 = vand.u32 4294901760, %v224_v6  ;;  %v698_v44 = vsub.s32 0, %v697_v43  ;;  %s703_s26 = scalar_lea.sflag [#allocation6], %s1255_s15  ;;  %s998_s27 = scalar_lea.vmem %s1286_s18, 16 }
  0x5c   : > { %845 = vmatprep.subr.mxu0 %v1088_v0  ;;  %p999_p8 = scmp.ne.s32.totalorder %s1286_s18, %s998_s27  ;;  %p1349_p0 = scmp.ne.s32.totalorder %s1341_s22, 0 }
  0x5d   : > { %v305_v9 = vand.u32 4294901760, %v304_v7  ;;  %v293_v10 = vsub.f32 %v224_v6, %v292_v8  ;;  %s1091_s12 = smov [#allocation9]  }
  0x5e   : > { %p1000_p7 = pnand %p999_p8, %p1349_p0  ;;  %s1002_s25 = sshll.u32 %s1091_s12, 4  ;;  %s1003_s25 = int_to_ptr.vmem [resolvable:$false] %s1002_s25 }
  0x5f   : > { %v306_v11 = vsub.f32 %v304_v7, %v305_v9  ;;  %v294_v12 = vand.u32 4294901760, %v293_v10  ;;  %v675_v17 = vld [vmem:[#allocation3] sm:$0x1]  ;;  %s1004_s28 = scalar_lea.vmem %s1003_s25, 32  ;;  %p1005_p10 = scmp.lt.s32.totalorder %s1286_s18, %s1003_s25 }
  0x60   : > { %p1001_p4 = pneg %p1000_p7  ;;  %p1006_p12 = scmp.lt.s32.totalorder %s1004_s28, %s998_s27 }
  0x61   : > { %v307_v13 = vand.u32 4294901760, %v306_v11  ;;  %v295_v14 = vsub.f32 %v293_v10, %v294_v12  ;;  %v220_v39 = vld [vmem:[#allocation2] sm:$0x1] }
  0x62   : > { %p1007_p1 = por %p1006_p12, %p1005_p10 }
  0x63   : > { %841 = vmatpush3.msra.mxu1 %v307_v13  ;;  %v296_v15 = vand.u32 4294901760, %v295_v14 }
  0x64   : > { %843 = vmatmul.mubr.f32.vlgmr.msra.gmra.mrb[0].mxu1 %v292_v8  ;;  %850 = vmatprep.subr.mxu1 %v1088_v0  ;;  %p1008_p2 = pnand %p1007_p1, %p1001_p4 }
  0x65   : > { %851 = vmatpush3.msra.mxu1 %v227_v4  ;;  %852 = vmatprep.mubr.msk.f32.mxu1 %vm1089_vm0, %v1088_v0 }
  0x66   : > { %838 = vmatmul.mubr.f32.vlgmr.msra.gmra.mrb[0].mxu0 %v296_v15  ;;  %860 = vmatprep.subr.mxu1 %v1088_v0 }
  0x67   : > { %846 = vmatpush3.msra.mxu0 %v304_v7  ;;  %847 = vmatprep.mubr.msk.f32.mxu0 %vm1089_vm0, %v1088_v0 }
  0x68   : > { %855 = vmatprep.subr.mxu0 %v1088_v0  ;;  %853 = vmatmul.mubr.f32.vlgmr.msra.gmra.mrb[2].mxu1 %v294_v12 }
  0x69   : > { %861 = vmatpush3.msra.mxu1 %v227_v4  ;;  %862 = vmatprep.mubr.msk.f32.mxu1 %vm1089_vm0, %v1088_v0 }
  0x6a   : > { %848 = vmatmul.mubr.f32.vlgmr.msra.gmra.mrb[2].mxu0 %v293_v10 }
  0x6b   : > { %856 = vmatpush3.msra.mxu0 %v305_v9  ;;  %857 = vmatprep.mubr.msk.f32.mxu0 %vm1089_vm0, %v1088_v0 }
  0x6c   : > { %863 = vmatmul.mubr.f32.vlgmr.msra.gmra.mrb[4].mxu1 %v292_v8 }
  0x6e   : > { %858 = vmatmul.mubr.f32.vlgmr.msra.gmra.mrb[4].mxu0 %v292_v8 }
  0xe8   : > { %v679_v18 = vpop.xlane.xlu0 %678 }
  0xe9   : > { %v680_v19 = vadd.f32 %v679_v18, %v675_v17 }
  0xeb   : > { %682 = vst.msk [vmem:[#allocation3] sm:$0x1] %vm216_vm1, %v680_v19 }
  0xf2   : > { %v686_v20 = vld [vmem:[#allocation3] sm:$0x1] }
  0xf3   : > { %v687_v21 = vmax.f32 %v686_v20, 1e-09 }
  0xf5   : > { %936 = vrcp.f32 %v687_v21 }
  0xff   : > { %v937_v22 = vpop.eup %936 }
 0x100   : > { %693 = vperm.xlu0 %935, %v937_v22  }
 0x137   : > { %v374_v23 = vpop.f32.mrb[0].mxu1 }
 0x138   : > { %v844_v24 = vpop.f32.mrb[1].mxu1 }
 0x139   : > { %v298_v25 = vpop.f32.mrb[0].mxu0 }
 0x13a   : > { %v839_v26 = vpop.f32.mrb[1].mxu0  ;;  %v375_v27 = vadd.f32 %v374_v23, %v298_v25 }
 0x13b   : > { %v522_v28 = vpop.f32.mrb[2].mxu1 }
 0x13c   : > { %v854_v29 = vpop.f32.mrb[3].mxu1 }
 0x13d   : > { %v448_v30 = vpop.f32.mrb[2].mxu0 }
 0x13e   : > { %v449_v31 = vadd.f32 %v448_v30, %v375_v27  ;;  %v849_v32 = vpop.f32.mrb[3].mxu0 }
 0x13f   : > { %v668_v33 = vpop.f32.mrb[4].mxu1 }
 0x140   : > { %v523_v34 = vadd.f32 %v522_v28, %v449_v31  ;;  %v864_v35 = vpop.f32.mrb[5].mxu1 }
 0x141   : > { %v596_v36 = vpop.f32.mrb[4].mxu0 }
 0x142   : > { %v597_v37 = vadd.f32 %v596_v36, %v523_v34  ;;  %v859_v38 = vpop.f32.mrb[5].mxu0 }
 0x144   : > { %v669_v40 = vadd.f32 %v668_v33, %v597_v37 }
 0x146   : > { %v672_v41 = vadd.f32 %v669_v40, %v220_v39 }
 0x148   : > { %674 = vst.msk [vmem:[#allocation2] sm:$0x1] %vm214_vm4, %v672_v41 }
 0x14f   : > { %v690_v47 = vld [vmem:[#allocation2] sm:$0x1] }
 0x17f   : > { %v694_v45 = vpop.permute.xlu0 %693 }
 0x180   : > { %v699_v46 = vrot.slane %v694_v45, %v698_v44 }
 0x182   : > { %v700_v48 = vmul.f32 %v699_v46, %v690_v47 }
 0x184   : > { %701 = vst.msk [vmem:[%s209_s8] sm:$0x1] %vm214_vm4, %v700_v48 }
 0x185   : > { %1011 = shalt.err (!%p1008_p2)
}
 0x186   : > { %s1012_s3 = scalar_lea.hbm %s1284_s20, 16  ;;  %s1016_s16 = scalar_lea.hbm %s1336_s2, 32 }
 0x187   : > { %p1013_p9 = scmp.ne.s32.totalorder %s1284_s20, %s1012_s3  ;;  %p1017_p6 = scmp.lt.u32.totalorder %s1284_s20, %s1336_s2 }
 0x188   : > { %p1018_p13 = scmp.lt.u32.totalorder %s1016_s16, %s1012_s3  ;;  %p1020_p8 = scmp.lt.u32.totalorder %s1012_s3, %s1284_s20 }
 0x189   : > { %p1014_p11 = pnand %p1013_p9, %p1349_p0 }
 0x18a   : > { %p1019_p5 = por %p1018_p13, %p1017_p6 }
 0x18b   : > { %p1015_p3 = pneg %p1014_p11 }
 0x18c   : > { %p1021_p7 = por %p1020_p8, %p1019_p5 }
 0x18e   : > { %p1022_p4 = pnand %p1021_p7, %p1015_p3 }
 0x190   : > { %1025 = shalt.err (!%p1022_p4)
}
 0x191   : > { %869 = dma.vmem_to_hbm [thread:$0]  (%p1349_p0), %s1286_s18, 16, %s1284_s20, %s703_s26  }
 0x192 PF: > { %s727_s5 = sand.u32 1, %s1064_s9   ;;  %p1350_p10 = scmp.ne.s32.totalorder %s1342_s24, 0 }
 0x193   : > { %p1351_p12 = scmp.ge.s32.totalorder %s1084_s14, 2  ;;  %s728_s29 = scalar_lea.sflag [#allocation6], %s727_s5 }
 0x195   : > { %p879_p1 = pnand %p1351_p12, %p1350_p10 }
 0x197   : > { %1059 = dma.done.wait (!%p879_p1), %s728_s29, 16  }
 0x198   : > { %1061 = vsyncadd (!%p879_p1), %s728_s29, 4294967280  ;;  %s21_s14 = sadd.s32 1, %s1084_s14   ;;  %s1352_s9 = smov %s1068_s10 }
 0x199   : > { %p18_p2 = scmp.ge.s32.totalorder %s21_s14, 4   ;;  %s1353_s10 = smov %s1072_s11 }
 0x19a   : > { %s1354_s11 = smov %s1163_s23  ;;  %s1355_s12 = smov %s1080_s13 }
 0x19b   : > { %s1356_s13 = smov %s1358_s17  ;;  %20 = sbr.rel (!%p18_p2) target bundleno = 8 (0x8), region = 94 }
 0x1a2   :  { %732 = vsyncpa [#allocation5], 1 }
 0x1a3   :  { %734 = vsyncpa [#allocation5 + $0x1], 1 }
 0x1a4   :  { %735 = vsyncpa [#allocation8], 1 }
 0x1a5   :  { %737 = vsyncpa [#allocation8 + $0x1], 1 }
 0x1a6   :  { %738 = vsyncpa [#allocation6], 1 }
 0x1a7   :  { %740 = vsyncpa [#allocation6 + $0x1], 1 }

</bundles_post_ra>
